<compile_context>
chip_gen: v5e
topology: v5e:2x2
jax: 0.10.0
libtpu: 0.0.40
codegen_flags: <defaults>
</compile_context>

<pallas_src>
import jax
import jax.numpy as jnp
import numpy as np
from jax.experimental import pallas as pl
from jax.experimental.pallas import tpu as pltpu


def _gpm_kernel(x_ref, w_ref, o_ref):
    """Whole batch in one block.

    x_ref : (R, HW)    R = N*C packed sample-channel rows, HW on the lane axis
    w_ref : (3, R, R)  [0]=block-diag conv1, [1]=block-diag (conv2/HW)^T,
                       [2]=block-diag conv3
    o_ref : (R, HW)
    """
    x = x_ref[...]                                                  # (R, HW)
    w1 = w_ref[0]                                                   # (R, R)
    w2t = w_ref[1]                                                  # (R, R)  (conv2/HW)^T
    w3 = w_ref[2]                                                   # (R, R)

    # block1 = conv1(x): one MXU matmul over all packed samples/channels.
    b1 = jnp.dot(w1, x, preferred_element_type=jnp.float32)        # (R, HW)

    # Global average pool folded as a plain sum (1/HW pre-folded into w2t).
    pooled = jnp.sum(b1, axis=1, keepdims=True)                    # (R, 1)

    # block2 = conv2(avg_pool(block1)): tiny matvec kept off the MXU.
    # b2[i] = sum_j w2s[i, j] * pooled[j]  ==  sublane-sum of (w2s^T * pooled)
    b2_row = jnp.sum(w2t * pooled, axis=0, keepdims=True)          # (1, R)

    # block3 = sigmoid(block2): exp on the EUP; division is on 8 scalars only.
    gate_row = 1.0 / (1.0 + jnp.exp(-b2_row))                      # (1, R)

    # block4 + block5 fused:
    #   b5 = w3 @ (b1 * (1 + gate)) == (w3 * (1 + gate)[None, :]) @ b1
    m = w3 * (1.0 + gate_row)                                      # (R, R) column scale
    b5 = jnp.dot(m, b1, preferred_element_type=jnp.float32)        # (R, HW)

    o_ref[...] = b5.astype(o_ref.dtype)


def global_pooling_forward(x_nchw, w1, w2, w3):
    """Forward pass of GlobalPoolingModule.

    x_nchw: (N, C, H, W) float32
    w1, w2, w3: (C, C, 1, 1) float32 -- bias-free Conv2d(1x1) weights
    (the PyTorch module requires inchannels == outchannels to be runnable).
    """
    n, c, h, w = x_nchw.shape
    hw = h * w
    r = n * c  # packed sample-channel rows (8 here -> full f32 sublane tile)

    # Pure reshape in NCHW memory order: channels of all samples stacked on
    # sublanes, flattened spatial on the 128-lane axis (HW=256 -> lane-dense).
    x2 = x_nchw.reshape(r, hw).astype(jnp.float32)

    w1m = w1.reshape(c, c).astype(jnp.float32)
    w2m = w2.reshape(c, c).astype(jnp.float32)
    w3m = w3.reshape(c, c).astype(jnp.float32)

    # Block-diagonal (R, R) weights: one copy of the (C, C) weight per sample.
    eye = jnp.eye(n, dtype=jnp.float32)

    def block_diag(wm):
        return jnp.einsum("ab,ij->aibj", eye, wm).reshape(r, r)

    w1_bd = block_diag(w1m)
    w2t_bd = block_diag(w2m.T / float(hw))   # transpose + fold 1/HW of the mean
    w3_bd = block_diag(w3m)
    wstk = jnp.stack([w1_bd, w2t_bd, w3_bd])  # (3, R, R) -> single operand/DMA

    y2 = pl.pallas_call(
        _gpm_kernel,
        out_shape=jax.ShapeDtypeStruct((r, hw), jnp.float32),
        grid=(1,),
        in_specs=[
            pl.BlockSpec((r, hw), lambda i: (0, 0)),
            pl.BlockSpec((3, r, r), lambda i: (0, 0, 0)),
        ],
        out_specs=pl.BlockSpec((r, hw), lambda i: (0, 0)),
        compiler_params=pltpu.CompilerParams(
            dimension_semantics=("parallel",)),
    )(x2, wstk)

    return y2.reshape(n, c, h, w)


def _reference_np(x, w1, w2, w3):
    """float64 numpy reference of the PyTorch forward pass."""
    x = np.asarray(x, np.float64)
    n, c, h, w = x.shape
    w1m = np.asarray(w1, np.float64).reshape(c, c)
    w2m = np.asarray(w2, np.float64).reshape(c, c)
    w3m = np.asarray(w3, np.float64).reshape(c, c)

    b1 = np.einsum("oc,nchw->nohw", w1m, x)
    pooled = b1.mean(axis=(2, 3), keepdims=True)
    b2 = np.einsum("oc,nchw->nohw", w2m, pooled)
    b3 = 1.0 / (1.0 + np.exp(-b2))
    b4 = b1 + b3 * b1
    b5 = np.einsum("oc,nchw->nohw", w3m, b4)
    return b5


if __name__ == "__main__":
    # GlobalPoolingModule(inchannels=4, outchannels=4); x: (2, 4, 16, 16)
    N, C, H, W = 2, 4, 16, 16

    key = jax.random.PRNGKey(0)
    kx, k1, k2, k3 = jax.random.split(key, 4)
    x = jax.random.normal(kx, (N, C, H, W), jnp.float32)

    bound = float(np.sqrt(1.0 / C))  # kaiming-uniform-like bound for 1x1 conv
    w1 = jax.random.uniform(k1, (C, C, 1, 1), jnp.float32, -bound, bound)
    w2 = jax.random.uniform(k2, (C, C, 1, 1), jnp.float32, -bound, bound)
    w3 = jax.random.uniform(k3, (C, C, 1, 1), jnp.float32, -bound, bound)

    out = jax.block_until_ready(global_pooling_forward(x, w1, w2, w3))
    ref = _reference_np(x, w1, w2, w3)

    np.testing.assert_allclose(np.asarray(out), ref, rtol=1e-4, atol=1e-4)
    print("KERNEL_OK")
</pallas_src>

<mosaic_0001>
module attributes {stable_mosaic.version = 11 : i64} {
  func.func @_gpm_kernel(%arg0: i32, %arg1: memref<8x256xf32, #tpu.memory_space<vmem>>, %arg2: memref<3x8x8xf32, #tpu.memory_space<vmem>>, %arg3: memref<8x256xf32, #tpu.memory_space<vmem>>) attributes {dimension_semantics = [#tpu.dimension_semantics<parallel>], iteration_bounds = array<i64: 1>, scalar_prefetch = 0 : i64, scratch_operands = 0 : i64, tpu.core_type = #tpu.core_type<tc>, window_params = [{pipeline_mode = #tpu.pipeline_mode<synchronous>, transform_indices = @transform_0, window_bounds = array<i64: 8, 256>}, {pipeline_mode = #tpu.pipeline_mode<synchronous>, transform_indices = @transform_1, window_bounds = array<i64: 3, 8, 8>}, {pipeline_mode = #tpu.pipeline_mode<synchronous>, transform_indices = @transform_2, window_bounds = array<i64: 8, 256>}]} {
    %c0 = arith.constant 0 : index
    %c0_0 = arith.constant 0 : index
    %0 = vector.load %arg1[%c0, %c0_0] : memref<8x256xf32, #tpu.memory_space<vmem>>, vector<8x256xf32>
    %c0_1 = arith.constant 0 : index
    %c0_2 = arith.constant 0 : index
    %c0_3 = arith.constant 0 : index
    %1 = vector.load %arg2[%c0_1, %c0_2, %c0_3] : memref<3x8x8xf32, #tpu.memory_space<vmem>>, vector<1x8x8xf32>
    %2 = vector.shape_cast %1 : vector<1x8x8xf32> to vector<8x8xf32>
    %c1 = arith.constant 1 : index
    %c0_4 = arith.constant 0 : index
    %c0_5 = arith.constant 0 : index
    %3 = vector.load %arg2[%c1, %c0_4, %c0_5] : memref<3x8x8xf32, #tpu.memory_space<vmem>>, vector<1x8x8xf32>
    %4 = vector.shape_cast %3 : vector<1x8x8xf32> to vector<8x8xf32>
    %c2 = arith.constant 2 : index
    %c0_6 = arith.constant 0 : index
    %c0_7 = arith.constant 0 : index
    %5 = vector.load %arg2[%c2, %c0_6, %c0_7] : memref<3x8x8xf32, #tpu.memory_space<vmem>>, vector<1x8x8xf32>
    %6 = vector.shape_cast %5 : vector<1x8x8xf32> to vector<8x8xf32>
    %cst = arith.constant dense<0.000000e+00> : vector<8x256xf32>
    %7 = tpu.matmul %2, %0, %cst {dimension_numbers = #tpu.dot_dimension_numbers<[1], [0], [0], [1], [0, 0, 1, 1], [], []>} : vector<8x8xf32>, vector<8x256xf32>, vector<8x256xf32> -> vector<8x256xf32>
    %cst_8 = arith.constant dense<0.000000e+00> : vector<8xf32>
    %8 = vector.multi_reduction <add>, %7, %cst_8 [1] : vector<8x256xf32> to vector<8xf32>
    %9 = vector.shape_cast %8 : vector<8xf32> to vector<8x1xf32>
    %10 = vector.broadcast %9 : vector<8x1xf32> to vector<8x8xf32>
    %11 = arith.mulf %4, %10 : vector<8x8xf32>
    %cst_9 = arith.constant dense<0.000000e+00> : vector<8xf32>
    %12 = vector.multi_reduction <add>, %11, %cst_9 [0] : vector<8x8xf32> to vector<8xf32>
    %13 = vector.shape_cast %12 : vector<8xf32> to vector<1x8xf32>
    %cst_10 = arith.constant 0.000000e+00 : f32
    %14 = vector.broadcast %cst_10 : f32 to vector<1x8xf32>
    %15 = arith.subf %14, %13 : vector<1x8xf32>
    %16 = math.exp %15 : vector<1x8xf32>
    %cst_11 = arith.constant 1.000000e+00 : f32
    %17 = vector.broadcast %cst_11 : f32 to vector<1x8xf32>
    %18 = arith.addf %17, %16 : vector<1x8xf32>
    %cst_12 = arith.constant 1.000000e+00 : f32
    %19 = vector.broadcast %cst_12 : f32 to vector<1x8xf32>
    %20 = arith.divf %19, %18 : vector<1x8xf32>
    %cst_13 = arith.constant 1.000000e+00 : f32
    %21 = vector.broadcast %cst_13 : f32 to vector<1x8xf32>
    %22 = arith.addf %21, %20 : vector<1x8xf32>
    %23 = vector.broadcast %22 : vector<1x8xf32> to vector<8x8xf32>
    %24 = arith.mulf %6, %23 : vector<8x8xf32>
    %cst_14 = arith.constant dense<0.000000e+00> : vector<8x256xf32>
    %25 = tpu.matmul %24, %7, %cst_14 {dimension_numbers = #tpu.dot_dimension_numbers<[1], [0], [0], [1], [0, 0, 1, 1], [], []>} : vector<8x8xf32>, vector<8x256xf32>, vector<8x256xf32> -> vector<8x256xf32>
    %c0_15 = arith.constant 0 : index
    %c0_16 = arith.constant 0 : index
    %26 = vector.load %arg3[%c0_15, %c0_16] : memref<8x256xf32, #tpu.memory_space<vmem>>, vector<8x256xf32>
    tpu.vector_store %arg3[%c0_15, %c0_16], %25 {strides = array<i32>} : memref<8x256xf32, #tpu.memory_space<vmem>>, vector<8x256xf32>,
    return
  }
  func.func @transform_0(%arg0: i32) -> (i32, i32) {
    %c0_i32 = arith.constant 0 : i32
    %c0_i32_0 = arith.constant 0 : i32
    %c0_i32_1 = arith.constant 0 : i32
    return %c0_i32, %c0_i32_0 : i32, i32
  }
  func.func @transform_1(%arg0: i32) -> (i32, i32, i32) {
    %c0_i32 = arith.constant 0 : i32
    %c0_i32_0 = arith.constant 0 : i32
    %c0_i32_1 = arith.constant 0 : i32
    %c0_i32_2 = arith.constant 0 : i32
    return %c0_i32, %c0_i32_0, %c0_i32_1 : i32, i32, i32
  }
  func.func @transform_2(%arg0: i32) -> (i32, i32) {
    %c0_i32 = arith.constant 0 : i32
    %c0_i32_0 = arith.constant 0 : i32
    %c0_i32_1 = arith.constant 0 : i32
    return %c0_i32, %c0_i32_0 : i32, i32
  }
}

</mosaic_0001>

<bundles_post_ra>
// kernel: tpu_custom_call.1
= control target key start
LH: loop header
LB: loop body
LE: loop exit
PB: predicated region body
PF: predicated region fallthrough
CT: control target
= control target key end

     0   :  { %7 = vsyncpa [#allocation3], 0  ;;  %s313_s0 = inlined_call_operand.hbm [shape: f32[8,256], index: 0, kind: input, shape index: {}]   ;;  %s314_s1 = inlined_call_operand.hbm [shape: f32[3,8,8], index: 1, kind: input, shape index: {}]   ;;  %s315_s2 = inlined_call_operand.hbm [shape: f32[8,256], index: 2, kind: output, shape index: {}]  }
   0x1   :  { %8 = vsyncpa [#allocation6], 0 }
   0x2   :  { %9 = vsyncpa [#allocation4], 0  ;;  %s15_s11 = sshll.u32 %s313_s0, 4  ;;  %s279_s12 = smov [#allocation2]   ;;  %s16_s11 = int_to_ptr.hbm [resolvable:$true] %s15_s11 }
   0x3   :  { %s17_s13 = sshll.u32 %s279_s12, 4  ;;  %s25_s16 = sshll.u32 %s314_s1, 4  ;;  %s18_s13 = int_to_ptr.vmem [resolvable:$true] %s17_s13  ;;  %s26_s16 = int_to_ptr.hbm [resolvable:$true] %s25_s16 }
   0x4   :  { %20 = dma.hbm_to_vmem [thread:$0]  %s16_s11, 256, %s18_s13, [#allocation3]  }
   0x5   :  { %s280_s17 = smov [#allocation5]   ;;  %s281_s19 = smov 128  }
   0x6   :  { %s27_s18 = sshll.u32 %s280_s17, 4  ;;  %s282_s20 = smov 8   ;;  %s28_s18 = int_to_ptr.vmem [resolvable:$true] %s27_s18 }
   0x7   :  { %33 = dma.hbm_to_vmem [thread:$0]  %s26_s16, 384, %s28_s18, [#allocation6], %s281_s19, %s281_s19, %s282_s20  }
   0x8   :  { %273 = dma.done.wait [#allocation3], 256  }
   0x9   :  { %274 = vsyncadd [#allocation3], 4294967040 }
   0xa   :  { %275 = dma.done.wait [#allocation6], 384  }
   0xb   :  { %276 = vsyncadd [#allocation6], 4294966912  ;;  %vm49_vm0 = vcmask 64512   ;;  %v42_v0 = vld [vmem:[#allocation2] sm:$0xff]  ;;  %v43_v1 = vld [vmem:[#allocation2 + $0x8] sm:$0xff]  ;;  %s283_s0 = smov [#allocation7]  }
   0xc   :  { %v44_v2 = vld [vmem:[#allocation5] sm:$0xff]  ;;  %68 = vmatpush.msra.mxu0 %v42_v0  ;;  %88 = vmatpush.msra.mxu1 %v43_v1  ;;  %v46_v6 = vld [vmem:[#allocation5 + $0x8] sm:$0xff]  ;;  %v48_v29 = vld [vmem:[#allocation5 + $0x10] sm:$0xff]  ;;  %s175_s1 = sshll.u32 %s283_s0, 4  ;;  %s177_s23 = sshll.u32 %s315_s2, 4  ;;  %s176_s1 = int_to_ptr.vmem [resolvable:$true] %s175_s1  ;;  %s178_s23 = int_to_ptr.hbm [resolvable:$true] %s177_s23 }
   0xd   :  { %188 = vmatmul.msk.f32.vlgmr.msra.gmra.mxu0 %vm49_vm0, %v44_v2  ;;  %189 = vmatmul.msk.f32.vlgmr.msra.gmra.mxu1 %vm49_vm0, %v44_v2 }
  0x8a   :  { %v70_v3 = vpop.f32.mrf.mxu0  ;;  %v90_v4 = vpop.f32.mrf.mxu1 }
  0x8b   :  { %143 = vmatpush.msra.mxu2 %v70_v3  ;;  %163 = vmatpush.msra.mxu3 %v90_v4  ;;  %v93_v5 = vadd.f32 %v90_v4, %v70_v3 }
  0x8d   :  { %94 = vadd.xlane.f32.xlu0 %v93_v5 }
 0x100   :  { %v95_v7 = vpop.xlane.xlu0 %94 }
 0x101   :  { %v96_v8 = vmul.f32 %v95_v7, %v46_v6 }
 0x103   :  { %v97_v9 = vsel %vm49_vm0, %v96_v8, 0.0 }
 0x104   :  { %v98_v10 = vrot.slane %v97_v9, 4 }
 0x106   :  { %v99_v11 = vadd.f32 %v98_v10, %v97_v9 }
 0x108   :  { %v100_v12 = vrot.slane %v99_v11, 2 }
 0x10a   :  { %v101_v13 = vadd.f32 %v100_v12, %v99_v11 }
 0x10c   :  { %v102_v14 = vrot.slane %v101_v13, 1 }
 0x10e   :  { %v103_v15 = vadd.f32 %v102_v14, %v101_v13 }
 0x110   :  { %v104_v16 = vsub.f32 0.0, %v103_v15 }
 0x112   :  { %v105_v17 = vmul.f32 1.442695, %v104_v16 }
 0x114   :  { %197 = vpow2.f32 %v105_v17 }
 0x11a   :  { %v198_v18 = vpop.eup %197 }
 0x11b   :  { %v107_v19 = vadd.f32 1.0, %v198_v18 }
 0x11d   :  { %199 = vrcp.f32 %v107_v19  ;;  %v119_v23 = vand.u32 2147483648, %v107_v19  ;;  %v117_v25 = vand.u32 2147483647, %v107_v19  ;;  %vm113_vm2 = vweird.f32 %v107_v19 }
 0x11f   :  { %v120_v27 = vor.u32 1.1754944e-38, %v119_v23  ;;  %vm118_vm4 = vcmp.eq.f32.partialorder %v117_v25, 8.507059e+37 }
 0x123   :  { %v200_v20 = vpop.eup %199 }
 0x124   :  { %v109_v21 = vmul.f32 %v200_v20, %v107_v19  ;;  %vm114_vm1 = vweird.f32 %v200_v20 }
 0x125   :  { %vm115_vm3 = vmor %vm113_vm2, %vm114_vm1 }
 0x126   :  { %v110_v22 = vsub.f32 1.0, %v109_v21 }
 0x128   :  { %v111_v24 = vmul.f32 %v200_v20, %v110_v22 }
 0x12a   :  { %v112_v26 = vadd.f32 %v200_v20, %v111_v24 }
 0x12c   :  { %v116_v28 = vsel %vm115_vm3, %v200_v20, %v112_v26 }
 0x12d   :  { %v121_v30 = vsel %vm118_vm4, %v120_v27, %v116_v28 }
 0x12e   :  { %v123_v31 = vadd.f32 1.0, %v121_v30 }
 0x130   :  { %v124_v32 = vmul.f32 %v123_v31, %v48_v29 }
 0x132   :  { %190 = vmatmul.msk.f32.vlgmr.msra.gmra.mxu2 %vm49_vm0, %v124_v32  ;;  %191 = vmatmul.msk.f32.vlgmr.msra.gmra.mxu3 %vm49_vm0, %v124_v32 }
 0x1b5   :  { %v145_v33 = vpop.f32.mrf.mxu2  ;;  %v165_v34 = vpop.f32.mrf.mxu3 }
 0x1b6   :  { %168 = vst [vmem:[#allocation7] sm:$0xff] %v145_v33 }
 0x1b7   :  { %169 = vst [vmem:[#allocation7 + $0x8] sm:$0xff] %v165_v34 }
 0x1b8   :  { %180 = dma.vmem_to_hbm [thread:$0]  %s176_s1, 256, %s178_s23, [#allocation4]  }
 0x1b9   :  { %277 = dma.done.wait [#allocation4], 256  }
 0x1ba   :  { %278 = vsyncadd [#allocation4], 4294967040 }
 0x1bb   :  { %185 = vsyncpa [#allocation3], 1 }
 0x1bc   :  { %186 = vsyncpa [#allocation6], 1 }
 0x1bd   :  { %187 = vsyncpa [#allocation4], 1 }

</bundles_post_ra>
